<compile_context>
chip_gen: v5e
topology: v5e:2x2
jax: 0.10.0
libtpu: 0.0.40
codegen_flags: <defaults>
</compile_context>

<pallas_src>
import numpy as np
import jax
import jax.numpy as jnp
from jax.experimental import pallas as pl
from jax.experimental.pallas import tpu as pltpu


# ---------------------------------------------------------------------------
# Host-side parameter setup (identical math to the PyTorch generate_anchors)
# ---------------------------------------------------------------------------
def generate_anchors(base_anchor_size=16):
    ratios = np.array([0.5, 1, 2])
    scales = np.array([2 ** 0, 2 ** (1.0 / 3.0), 2 ** (2.0 / 3.0)])
    num_anchors = len(ratios) * len(scales)
    anchors = np.zeros((num_anchors, 4))
    anchors[:, 2:] = base_anchor_size * np.tile(scales, (2, len(ratios))).T
    areas = anchors[:, 2] * anchors[:, 3]
    anchors[:, 2] = np.sqrt(areas / np.repeat(ratios, len(scales)))
    anchors[:, 3] = anchors[:, 2] * np.repeat(ratios, len(scales))
    anchors[:, 0::2] -= np.tile(anchors[:, 2] * 0.5, (2, 1)).T
    anchors[:, 1::2] -= np.tile(anchors[:, 3] * 0.5, (2, 1)).T
    return anchors  # float64, shape (9, 4)


# NumPy reference for one level (same math as PyTorch `shift`); used only for
# verification in __main__.
def shift_ref(shape, stride, anchors):
    shift_x = (np.arange(0, shape[1]) + 0.5) * stride
    shift_y = (np.arange(0, shape[0]) + 0.5) * stride
    shift_x, shift_y = np.meshgrid(shift_x, shift_y)
    shifts = np.vstack(
        (shift_x.ravel(), shift_y.ravel(), shift_x.ravel(), shift_y.ravel())
    ).transpose()
    A = anchors.shape[0]
    K = shifts.shape[0]
    all_anchors = anchors.reshape((1, A, 4)) + shifts.reshape((1, K, 4)).transpose((1, 0, 2))
    return all_anchors.reshape((K * A, 4))


# ---------------------------------------------------------------------------
# Host-side precompute of the per-level constant lane rows.
# Lane j of a row encodes (x, a, c) with j = x*36 + a*4 + c:
#   base_row[j] = anchor[a, c] + (x + 0.5) * stride   if c is even (x coord)
#               = anchor[a, c] + 0.5 * stride         if c is odd  (y coord)
#   ymul_row[j] = stride if c is odd else 0
# so kernel output[y, j] = base_row[j] + ymul_row[j] * y   (y = integer row).
# The +0.5 of the y shift is folded into base_row -> kernel does 1 mul + 1 add.
# ---------------------------------------------------------------------------
def _level_const_rows(anchors_f64, fw, stride):
    cell = anchors_f64.reshape(-1)                          # (36,) order a*4 + c
    pos = np.arange(36)
    is_x = (pos % 2 == 0).astype(np.float64)                # even coord cols -> x
    is_y = 1.0 - is_x
    x_centers = (np.arange(fw) + 0.5) * float(stride)       # (fw,)
    base = (cell[None, :]
            + x_centers[:, None] * is_x[None, :]
            + (0.5 * float(stride)) * is_y[None, :])        # (fw, 36) f64
    ymul = np.tile(is_y * float(stride), fw)                # (fw*36,)
    w = fw * 36
    base_row = jnp.asarray(base.reshape(1, w), dtype=jnp.float32)
    ymul_row = jnp.asarray(ymul.reshape(1, w), dtype=jnp.float32)
    return base_row, ymul_row


def _choose_tile_rows(fh, w_lanes, target_bytes=2 * 1024 * 1024):
    """Largest row tile keeping one output block around ~2 MiB (using the
    lane-padded width), multiple of 8 (or the full fh) so the (8,128) block
    constraint holds.  2 MiB tiles x 5 outputs x 2 buffers stays well inside
    the default scoped VMEM of every TPU generation."""
    padded_w = ((w_lanes + 127) // 128) * 128
    max_rows = max(8, target_bytes // (padded_w * 4))
    if fh <= max_rows:
        return fh
    return int(max(8, (max_rows // 8) * 8))


# ---------------------------------------------------------------------------
# Fused Pallas kernel: all pyramid levels in one call.
#   grid step i handles one row-tile of one level:
#     lvl_ref[i]  -> which level this step belongs to
#     row0_ref[i] -> first feature-map row of the tile within that level
#     blk_ref     -> (nsteps * n_levels) flat table of output block indices,
#                    read only by the output index_maps (held block while a
#                    different level is running).
#   out[y, j] = base_row[j] + ymul_row[j] * y
# Rows of the last (partial) tile that fall past fh are computed but dropped
# by Pallas' out-of-bounds output-block handling (documented behavior); do not
# convert this to a manual DMA without masking those rows.
# ---------------------------------------------------------------------------
def _fused_kernel(lvl_ref, row0_ref, blk_ref, *refs):
    del blk_ref  # used only inside the output index_maps
    n = len(refs) // 3
    base_refs = refs[0:2 * n:2]
    ymul_refs = refs[1:2 * n:2]
    out_refs = refs[2 * n:]

    i = pl.program_id(0)
    lvl = lvl_ref[i]
    row0_f = row0_ref[i].astype(jnp.float32)

    for l in range(n):
        @pl.when(lvl == l)
        def _(l=l):
            tr = out_refs[l].shape[0]
            if tr == 1:
                y = row0_f                                   # scalar broadcast
            else:
                y = (jax.lax.broadcasted_iota(jnp.int32, (tr, 1), 0)
                     .astype(jnp.float32) + row0_f)          # (tr, 1) column
            # (1, w) + (1, w) * (tr, 1)  ->  (tr, w): one mul + one add / elem.
            out_refs[l][...] = base_refs[l][...] + ymul_refs[l][...] * y
        del _


def _build_anchors(h, w, pyramid_levels, strides, sizes):
    n_lvl = len(pyramid_levels)

    fhs, widths, tile_rows, ntiles = [], [], [], []
    bases, ymuls = [], []
    for idx, p in enumerate(pyramid_levels):
        fh = (h + 2 ** p - 1) // 2 ** p
        fw = (w + 2 ** p - 1) // 2 ** p
        anchors = generate_anchors(base_anchor_size=sizes[idx])
        b_row, y_row = _level_const_rows(anchors, fw, strides[idx])
        wl = fw * 36
        tr = _choose_tile_rows(fh, wl)
        fhs.append(fh)
        widths.append(wl)
        tile_rows.append(tr)
        ntiles.append((fh + tr - 1) // tr)
        bases.append(b_row)
        ymuls.append(y_row)

    # Per-step scalar tables (prefetched into SMEM).
    lvl_tab, row0_tab, blk_tab = [], [], []
    for l in range(n_lvl):
        for t in range(ntiles[l]):
            lvl_tab.append(l)
            row0_tab.append(t * tile_rows[l])
            for m in range(n_lvl):
                if l < m:
                    blk_tab.append(0)                # level m not started: hold 0
                elif l == m:
                    blk_tab.append(t)                # active level: real tile
                else:
                    blk_tab.append(ntiles[m] - 1)    # level m finished: hold last
    nsteps = len(lvl_tab)
    lvl_arr = jnp.asarray(lvl_tab, dtype=jnp.int32)
    row0_arr = jnp.asarray(row0_tab, dtype=jnp.int32)
    blk_arr = jnp.asarray(blk_tab, dtype=jnp.int32)

    in_specs = []
    for l in range(n_lvl):
        const_spec = pl.BlockSpec((1, widths[l]), lambda i, lvl, row0, blk: (0, 0))
        in_specs += [const_spec, const_spec]         # base_row, ymul_row

    out_specs = [
        pl.BlockSpec(
            (tile_rows[l], widths[l]),
            lambda i, lvl, row0, blk, l=l: (blk[i * n_lvl + l], 0),
        )
        for l in range(n_lvl)
    ]
    out_shape = tuple(
        jax.ShapeDtypeStruct((fhs[l], widths[l]), jnp.float32) for l in range(n_lvl)
    )

    grid_spec = pltpu.PrefetchScalarGridSpec(
        num_scalar_prefetch=3,
        grid=(nsteps,),
        in_specs=in_specs,
        out_specs=out_specs,
    )

    args = [lvl_arr, row0_arr, blk_arr]
    for l in range(n_lvl):
        args += [bases[l], ymuls[l]]

    outs = pl.pallas_call(
        _fused_kernel,
        out_shape=out_shape,
        grid_spec=grid_spec,
        compiler_params=pltpu.CompilerParams(
            # "arbitrary": outputs hold their block while other levels run, so
            # the fused grid must stay sequential (not megacore-shardable).
            dimension_semantics=("arbitrary",),
            vmem_limit_bytes=32 * 1024 * 1024,
        ),
    )(*args)

    # Single flatten + concat + reshape to the PyTorch (1, N_total, 4) order.
    all_flat = jnp.concatenate([o.reshape(-1) for o in outs], axis=0)
    return all_flat.reshape(1, -1, 4)


# ---------------------------------------------------------------------------
# Module wrapper (mirrors Anchors.forward); input is NCHW, only H/W are used.
# ---------------------------------------------------------------------------
class AnchorsPallas:
    def __init__(self):
        self.pyramid_levels = [3, 4, 5, 6, 7]
        self.strides = [2 ** x for x in self.pyramid_levels]
        self.sizes = [2 ** (x + 2) for x in self.pyramid_levels]
        # Result depends only on the static spatial shape; cache amortizes the
        # single fused launch + compile per new (H, W).
        self._cache = {}

    def __call__(self, image):
        h, w = int(image.shape[2]), int(image.shape[3])
        key = (h, w)
        if key not in self._cache:
            self._cache[key] = _build_anchors(
                h, w, self.pyramid_levels, self.strides, self.sizes
            )
        return self._cache[key]


if __name__ == "__main__":
    key = jax.random.PRNGKey(0)
    image = jax.random.normal(key, (2, 4, 16, 16), dtype=jnp.float32)

    model = AnchorsPallas()
    out = model(image)
    out = jax.block_until_ready(out)

    # NumPy reference (identical math to the PyTorch module).
    image_shape = np.array(image.shape[2:])
    ref_levels = []
    for idx, p in enumerate(model.pyramid_levels):
        fm = (image_shape + 2 ** p - 1) // 2 ** p
        a = generate_anchors(base_anchor_size=model.sizes[idx])
        ref_levels.append(shift_ref(fm, model.strides[idx], a))
    ref = np.expand_dims(np.concatenate(ref_levels, axis=0), axis=0).astype(np.float32)

    assert out.shape == ref.shape, (out.shape, ref.shape)
    assert out.dtype == jnp.float32
    np.testing.assert_allclose(np.asarray(out), ref, rtol=1e-5, atol=1e-4)
    print("KERNEL_OK")
</pallas_src>

<mosaic_0001>
module attributes {stable_mosaic.version = 11 : i64} {
  func.func @_fused_kernel(%arg0: i32, %arg1: memref<5xi32, #tpu.memory_space<smem>>, %arg2: memref<5xi32, #tpu.memory_space<smem>>, %arg3: memref<25xi32, #tpu.memory_space<smem>>, %arg4: memref<1x72xf32, #tpu.memory_space<vmem>>, %arg5: memref<1x72xf32, #tpu.memory_space<vmem>>, %arg6: memref<1x36xf32, #tpu.memory_space<vmem>>, %arg7: memref<1x36xf32, #tpu.memory_space<vmem>>, %arg8: memref<1x36xf32, #tpu.memory_space<vmem>>, %arg9: memref<1x36xf32, #tpu.memory_space<vmem>>, %arg10: memref<1x36xf32, #tpu.memory_space<vmem>>, %arg11: memref<1x36xf32, #tpu.memory_space<vmem>>, %arg12: memref<1x36xf32, #tpu.memory_space<vmem>>, %arg13: memref<1x36xf32, #tpu.memory_space<vmem>>, %arg14: memref<2x72xf32, #tpu.memory_space<vmem>>, %arg15: memref<1x36xf32, #tpu.memory_space<vmem>>, %arg16: memref<1x36xf32, #tpu.memory_space<vmem>>, %arg17: memref<1x36xf32, #tpu.memory_space<vmem>>, %arg18: memref<1x36xf32, #tpu.memory_space<vmem>>) attributes {dimension_semantics = [#tpu.dimension_semantics<arbitrary>], iteration_bounds = array<i64: 5>, scalar_prefetch = 3 : i64, scratch_operands = 0 : i64, tpu.core_type = #tpu.core_type<tc>, window_params = [{pipeline_mode = #tpu.pipeline_mode<synchronous>, transform_indices = @transform_0, window_bounds = array<i64: 1, 72>}, {pipeline_mode = #tpu.pipeline_mode<synchronous>, transform_indices = @transform_1, window_bounds = array<i64: 1, 72>}, {pipeline_mode = #tpu.pipeline_mode<synchronous>, transform_indices = @transform_2, window_bounds = array<i64: 1, 36>}, {pipeline_mode = #tpu.pipeline_mode<synchronous>, transform_indices = @transform_3, window_bounds = array<i64: 1, 36>}, {pipeline_mode = #tpu.pipeline_mode<synchronous>, transform_indices = @transform_4, window_bounds = array<i64: 1, 36>}, {pipeline_mode = #tpu.pipeline_mode<synchronous>, transform_indices = @transform_5, window_bounds = array<i64: 1, 36>}, {pipeline_mode = #tpu.pipeline_mode<synchronous>, transform_indices = @transform_6, window_bounds = array<i64: 1, 36>}, {pipeline_mode = #tpu.pipeline_mode<synchronous>, transform_indices = @transform_7, window_bounds = array<i64: 1, 36>}, {pipeline_mode = #tpu.pipeline_mode<synchronous>, transform_indices = @transform_8, window_bounds = array<i64: 1, 36>}, {pipeline_mode = #tpu.pipeline_mode<synchronous>, transform_indices = @transform_9, window_bounds = array<i64: 1, 36>}, {transform_indices = @transform_10, window_bounds = array<i64: 2, 72>}, {transform_indices = @transform_11, window_bounds = array<i64: 1, 36>}, {transform_indices = @transform_12, window_bounds = array<i64: 1, 36>}, {transform_indices = @transform_13, window_bounds = array<i64: 1, 36>}, {transform_indices = @transform_14, window_bounds = array<i64: 1, 36>}]} {
    %0 = arith.index_cast %arg0 : i32 to index
    %1 = memref.load %arg1[%0] : memref<5xi32, #tpu.memory_space<smem>>
    %2 = arith.index_cast %arg0 : i32 to index
    %3 = memref.load %arg2[%2] : memref<5xi32, #tpu.memory_space<smem>>
    %4 = arith.sitofp %3 : i32 to f32
    %c0_i32 = arith.constant 0 : i32
    %5 = arith.cmpi eq, %1, %c0_i32 : i32
    %6 = arith.extui %5 : i1 to i32
    %c0_i32_0 = arith.constant 0 : i32
    %7 = arith.cmpi ne, %6, %c0_i32_0 : i32
    scf.if %7 {
      %20 = tpu.iota {dimensions = array<i32: 0>} : vector<2x1xi32>
      %21 = arith.sitofp %20 : vector<2x1xi32> to vector<2x1xf32>
      %22 = vector.broadcast %4 : f32 to vector<2x1xf32>
      %23 = arith.addf %21, %22 : vector<2x1xf32>
      %c0 = arith.constant 0 : index
      %c0_5 = arith.constant 0 : index
      %24 = vector.load %arg4[%c0, %c0_5] : memref<1x72xf32, #tpu.memory_space<vmem>>, vector<1x72xf32>
      %c0_6 = arith.constant 0 : index
      %c0_7 = arith.constant 0 : index
      %25 = vector.load %arg5[%c0_6, %c0_7] : memref<1x72xf32, #tpu.memory_space<vmem>>, vector<1x72xf32>
      %26 = vector.broadcast %25 : vector<1x72xf32> to vector<2x72xf32>
      %27 = vector.broadcast %23 : vector<2x1xf32> to vector<2x72xf32>
      %28 = arith.mulf %26, %27 : vector<2x72xf32>
      %29 = vector.broadcast %24 : vector<1x72xf32> to vector<2x72xf32>
      %30 = arith.addf %29, %28 : vector<2x72xf32>
      %c0_8 = arith.constant 0 : index
      %c0_9 = arith.constant 0 : index
      %31 = vector.load %arg14[%c0_8, %c0_9] : memref<2x72xf32, #tpu.memory_space<vmem>>, vector<2x72xf32>
      tpu.vector_store %arg14[%c0_8, %c0_9], %30 {strides = array<i32>} : memref<2x72xf32, #tpu.memory_space<vmem>>, vector<2x72xf32>,
    } else {
    }
    %c1_i32 = arith.constant 1 : i32
    %8 = arith.cmpi eq, %1, %c1_i32 : i32
    %9 = arith.extui %8 : i1 to i32
    %c0_i32_1 = arith.constant 0 : i32
    %10 = arith.cmpi ne, %9, %c0_i32_1 : i32
    scf.if %10 {
      %c0 = arith.constant 0 : index
      %c0_5 = arith.constant 0 : index
      %20 = vector.load %arg6[%c0, %c0_5] : memref<1x36xf32, #tpu.memory_space<vmem>>, vector<1x36xf32>
      %c0_6 = arith.constant 0 : index
      %c0_7 = arith.constant 0 : index
      %21 = vector.load %arg7[%c0_6, %c0_7] : memref<1x36xf32, #tpu.memory_space<vmem>>, vector<1x36xf32>
      %22 = vector.broadcast %4 : f32 to vector<1x36xf32>
      %23 = arith.mulf %21, %22 : vector<1x36xf32>
      %24 = arith.addf %20, %23 : vector<1x36xf32>
      %c0_8 = arith.constant 0 : index
      %c0_9 = arith.constant 0 : index
      %25 = vector.load %arg15[%c0_8, %c0_9] : memref<1x36xf32, #tpu.memory_space<vmem>>, vector<1x36xf32>
      tpu.vector_store %arg15[%c0_8, %c0_9], %24 {strides = array<i32>} : memref<1x36xf32, #tpu.memory_space<vmem>>, vector<1x36xf32>,
    } else {
    }
    %c2_i32 = arith.constant 2 : i32
    %11 = arith.cmpi eq, %1, %c2_i32 : i32
    %12 = arith.extui %11 : i1 to i32
    %c0_i32_2 = arith.constant 0 : i32
    %13 = arith.cmpi ne, %12, %c0_i32_2 : i32
    scf.if %13 {
      %c0 = arith.constant 0 : index
      %c0_5 = arith.constant 0 : index
      %20 = vector.load %arg8[%c0, %c0_5] : memref<1x36xf32, #tpu.memory_space<vmem>>, vector<1x36xf32>
      %c0_6 = arith.constant 0 : index
      %c0_7 = arith.constant 0 : index
      %21 = vector.load %arg9[%c0_6, %c0_7] : memref<1x36xf32, #tpu.memory_space<vmem>>, vector<1x36xf32>
      %22 = vector.broadcast %4 : f32 to vector<1x36xf32>
      %23 = arith.mulf %21, %22 : vector<1x36xf32>
      %24 = arith.addf %20, %23 : vector<1x36xf32>
      %c0_8 = arith.constant 0 : index
      %c0_9 = arith.constant 0 : index
      %25 = vector.load %arg16[%c0_8, %c0_9] : memref<1x36xf32, #tpu.memory_space<vmem>>, vector<1x36xf32>
      tpu.vector_store %arg16[%c0_8, %c0_9], %24 {strides = array<i32>} : memref<1x36xf32, #tpu.memory_space<vmem>>, vector<1x36xf32>,
    } else {
    }
    %c3_i32 = arith.constant 3 : i32
    %14 = arith.cmpi eq, %1, %c3_i32 : i32
    %15 = arith.extui %14 : i1 to i32
    %c0_i32_3 = arith.constant 0 : i32
    %16 = arith.cmpi ne, %15, %c0_i32_3 : i32
    scf.if %16 {
      %c0 = arith.constant 0 : index
      %c0_5 = arith.constant 0 : index
      %20 = vector.load %arg10[%c0, %c0_5] : memref<1x36xf32, #tpu.memory_space<vmem>>, vector<1x36xf32>
      %c0_6 = arith.constant 0 : index
      %c0_7 = arith.constant 0 : index
      %21 = vector.load %arg11[%c0_6, %c0_7] : memref<1x36xf32, #tpu.memory_space<vmem>>, vector<1x36xf32>
      %22 = vector.broadcast %4 : f32 to vector<1x36xf32>
      %23 = arith.mulf %21, %22 : vector<1x36xf32>
      %24 = arith.addf %20, %23 : vector<1x36xf32>
      %c0_8 = arith.constant 0 : index
      %c0_9 = arith.constant 0 : index
      %25 = vector.load %arg17[%c0_8, %c0_9] : memref<1x36xf32, #tpu.memory_space<vmem>>, vector<1x36xf32>
      tpu.vector_store %arg17[%c0_8, %c0_9], %24 {strides = array<i32>} : memref<1x36xf32, #tpu.memory_space<vmem>>, vector<1x36xf32>,
    } else {
    }
    %c4_i32 = arith.constant 4 : i32
    %17 = arith.cmpi eq, %1, %c4_i32 : i32
    %18 = arith.extui %17 : i1 to i32
    %c0_i32_4 = arith.constant 0 : i32
    %19 = arith.cmpi ne, %18, %c0_i32_4 : i32
    scf.if %19 {
      %c0 = arith.constant 0 : index
      %c0_5 = arith.constant 0 : index
      %20 = vector.load %arg12[%c0, %c0_5] : memref<1x36xf32, #tpu.memory_space<vmem>>, vector<1x36xf32>
      %c0_6 = arith.constant 0 : index
      %c0_7 = arith.constant 0 : index
      %21 = vector.load %arg13[%c0_6, %c0_7] : memref<1x36xf32, #tpu.memory_space<vmem>>, vector<1x36xf32>
      %22 = vector.broadcast %4 : f32 to vector<1x36xf32>
      %23 = arith.mulf %21, %22 : vector<1x36xf32>
      %24 = arith.addf %20, %23 : vector<1x36xf32>
      %c0_8 = arith.constant 0 : index
      %c0_9 = arith.constant 0 : index
      %25 = vector.load %arg18[%c0_8, %c0_9] : memref<1x36xf32, #tpu.memory_space<vmem>>, vector<1x36xf32>
      tpu.vector_store %arg18[%c0_8, %c0_9], %24 {strides = array<i32>} : memref<1x36xf32, #tpu.memory_space<vmem>>, vector<1x36xf32>,
    } else {
    }
    return
  }
  func.func @transform_0(%arg0: i32, %arg1: memref<5xi32, #tpu.memory_space<smem>>, %arg2: memref<5xi32, #tpu.memory_space<smem>>, %arg3: memref<25xi32, #tpu.memory_space<smem>>) -> (i32, i32) {
    %c0_i32 = arith.constant 0 : i32
    %c0_i32_0 = arith.constant 0 : i32
    %c0_i32_1 = arith.constant 0 : i32
    return %c0_i32, %c0_i32_0 : i32, i32
  }
  func.func @transform_1(%arg0: i32, %arg1: memref<5xi32, #tpu.memory_space<smem>>, %arg2: memref<5xi32, #tpu.memory_space<smem>>, %arg3: memref<25xi32, #tpu.memory_space<smem>>) -> (i32, i32) {
    %c0_i32 = arith.constant 0 : i32
    %c0_i32_0 = arith.constant 0 : i32
    %c0_i32_1 = arith.constant 0 : i32
    return %c0_i32, %c0_i32_0 : i32, i32
  }
  func.func @transform_2(%arg0: i32, %arg1: memref<5xi32, #tpu.memory_space<smem>>, %arg2: memref<5xi32, #tpu.memory_space<smem>>, %arg3: memref<25xi32, #tpu.memory_space<smem>>) -> (i32, i32) {
    %c0_i32 = arith.constant 0 : i32
    %c0_i32_0 = arith.constant 0 : i32
    %c0_i32_1 = arith.constant 0 : i32
    return %c0_i32, %c0_i32_0 : i32, i32
  }
  func.func @transform_3(%arg0: i32, %arg1: memref<5xi32, #tpu.memory_space<smem>>, %arg2: memref<5xi32, #tpu.memory_space<smem>>, %arg3: memref<25xi32, #tpu.memory_space<smem>>) -> (i32, i32) {
    %c0_i32 = arith.constant 0 : i32
    %c0_i32_0 = arith.constant 0 : i32
    %c0_i32_1 = arith.constant 0 : i32
    return %c0_i32, %c0_i32_0 : i32, i32
  }
  func.func @transform_4(%arg0: i32, %arg1: memref<5xi32, #tpu.memory_space<smem>>, %arg2: memref<5xi32, #tpu.memory_space<smem>>, %arg3: memref<25xi32, #tpu.memory_space<smem>>) -> (i32, i32) {
    %c0_i32 = arith.constant 0 : i32
    %c0_i32_0 = arith.constant 0 : i32
    %c0_i32_1 = arith.constant 0 : i32
    return %c0_i32, %c0_i32_0 : i32, i32
  }
  func.func @transform_5(%arg0: i32, %arg1: memref<5xi32, #tpu.memory_space<smem>>, %arg2: memref<5xi32, #tpu.memory_space<smem>>, %arg3: memref<25xi32, #tpu.memory_space<smem>>) -> (i32, i32) {
    %c0_i32 = arith.constant 0 : i32
    %c0_i32_0 = arith.constant 0 : i32
    %c0_i32_1 = arith.constant 0 : i32
    return %c0_i32, %c0_i32_0 : i32, i32
  }
  func.func @transform_6(%arg0: i32, %arg1: memref<5xi32, #tpu.memory_space<smem>>, %arg2: memref<5xi32, #tpu.memory_space<smem>>, %arg3: memref<25xi32, #tpu.memory_space<smem>>) -> (i32, i32) {
    %c0_i32 = arith.constant 0 : i32
    %c0_i32_0 = arith.constant 0 : i32
    %c0_i32_1 = arith.constant 0 : i32
    return %c0_i32, %c0_i32_0 : i32, i32
  }
  func.func @transform_7(%arg0: i32, %arg1: memref<5xi32, #tpu.memory_space<smem>>, %arg2: memref<5xi32, #tpu.memory_space<smem>>, %arg3: memref<25xi32, #tpu.memory_space<smem>>) -> (i32, i32) {
    %c0_i32 = arith.constant 0 : i32
    %c0_i32_0 = arith.constant 0 : i32
    %c0_i32_1 = arith.constant 0 : i32
    return %c0_i32, %c0_i32_0 : i32, i32
  }
  func.func @transform_8(%arg0: i32, %arg1: memref<5xi32, #tpu.memory_space<smem>>, %arg2: memref<5xi32, #tpu.memory_space<smem>>, %arg3: memref<25xi32, #tpu.memory_space<smem>>) -> (i32, i32) {
    %c0_i32 = arith.constant 0 : i32
    %c0_i32_0 = arith.constant 0 : i32
    %c0_i32_1 = arith.constant 0 : i32
    return %c0_i32, %c0_i32_0 : i32, i32
  }
  func.func @transform_9(%arg0: i32, %arg1: memref<5xi32, #tpu.memory_space<smem>>, %arg2: memref<5xi32, #tpu.memory_space<smem>>, %arg3: memref<25xi32, #tpu.memory_space<smem>>) -> (i32, i32) {
    %c0_i32 = arith.constant 0 : i32
    %c0_i32_0 = arith.constant 0 : i32
    %c0_i32_1 = arith.constant 0 : i32
    return %c0_i32, %c0_i32_0 : i32, i32
  }
  func.func @transform_10(%arg0: i32, %arg1: memref<5xi32, #tpu.memory_space<smem>>, %arg2: memref<5xi32, #tpu.memory_space<smem>>, %arg3: memref<25xi32, #tpu.memory_space<smem>>) -> (i32, i32) {
    %c5_i32 = arith.constant 5 : i32
    %0 = arith.muli %arg0, %c5_i32 : i32
    %c0_i32 = arith.constant 0 : i32
    %1 = arith.addi %0, %c0_i32 : i32
    %2 = arith.index_cast %1 : i32 to index
    %3 = memref.load %arg3[%2] : memref<25xi32, #tpu.memory_space<smem>>
    %c0_i32_0 = arith.constant 0 : i32
    %c0_i32_1 = arith.constant 0 : i32
    return %3, %c0_i32_0 : i32, i32
  }
  func.func @transform_11(%arg0: i32, %arg1: memref<5xi32, #tpu.memory_space<smem>>, %arg2: memref<5xi32, #tpu.memory_space<smem>>, %arg3: memref<25xi32, #tpu.memory_space<smem>>) -> (i32, i32) {
    %c5_i32 = arith.constant 5 : i32
    %0 = arith.muli %arg0, %c5_i32 : i32
    %c1_i32 = arith.constant 1 : i32
    %1 = arith.addi %0, %c1_i32 : i32
    %2 = arith.index_cast %1 : i32 to index
    %3 = memref.load %arg3[%2] : memref<25xi32, #tpu.memory_space<smem>>
    %c0_i32 = arith.constant 0 : i32
    %c0_i32_0 = arith.constant 0 : i32
    return %3, %c0_i32 : i32, i32
  }
  func.func @transform_12(%arg0: i32, %arg1: memref<5xi32, #tpu.memory_space<smem>>, %arg2: memref<5xi32, #tpu.memory_space<smem>>, %arg3: memref<25xi32, #tpu.memory_space<smem>>) -> (i32, i32) {
    %c5_i32 = arith.constant 5 : i32
    %0 = arith.muli %arg0, %c5_i32 : i32
    %c2_i32 = arith.constant 2 : i32
    %1 = arith.addi %0, %c2_i32 : i32
    %2 = arith.index_cast %1 : i32 to index
    %3 = memref.load %arg3[%2] : memref<25xi32, #tpu.memory_space<smem>>
    %c0_i32 = arith.constant 0 : i32
    %c0_i32_0 = arith.constant 0 : i32
    return %3, %c0_i32 : i32, i32
  }
  func.func @transform_13(%arg0: i32, %arg1: memref<5xi32, #tpu.memory_space<smem>>, %arg2: memref<5xi32, #tpu.memory_space<smem>>, %arg3: memref<25xi32, #tpu.memory_space<smem>>) -> (i32, i32) {
    %c5_i32 = arith.constant 5 : i32
    %0 = arith.muli %arg0, %c5_i32 : i32
    %c3_i32 = arith.constant 3 : i32
    %1 = arith.addi %0, %c3_i32 : i32
    %2 = arith.index_cast %1 : i32 to index
    %3 = memref.load %arg3[%2] : memref<25xi32, #tpu.memory_space<smem>>
    %c0_i32 = arith.constant 0 : i32
    %c0_i32_0 = arith.constant 0 : i32
    return %3, %c0_i32 : i32, i32
  }
  func.func @transform_14(%arg0: i32, %arg1: memref<5xi32, #tpu.memory_space<smem>>, %arg2: memref<5xi32, #tpu.memory_space<smem>>, %arg3: memref<25xi32, #tpu.memory_space<smem>>) -> (i32, i32) {
    %c5_i32 = arith.constant 5 : i32
    %0 = arith.muli %arg0, %c5_i32 : i32
    %c4_i32 = arith.constant 4 : i32
    %1 = arith.addi %0, %c4_i32 : i32
    %2 = arith.index_cast %1 : i32 to index
    %3 = memref.load %arg3[%2] : memref<25xi32, #tpu.memory_space<smem>>
    %c0_i32 = arith.constant 0 : i32
    %c0_i32_0 = arith.constant 0 : i32
    return %3, %c0_i32 : i32, i32
  }
}

</mosaic_0001>

<bundles_post_ra>
// kernel: tpu_custom_call.1
= control target key start
LH: loop header
LB: loop body
LE: loop exit
PB: predicated region body
PF: predicated region fallthrough
CT: control target
= control target key end

     0   :  { %s1369_s30 = smov [#allocation4]   ;;  %s1370_s20 = smov [#allocation5]   ;;  %s1956_s0 = inlined_call_operand.hbm [shape: s32[5], index: 0, kind: input, shape index: {}]   ;;  %s1957_s3 = inlined_call_operand.vmem [shape: f32[1,72], index: 3, kind: input, shape index: {}]   ;;  %s1958_s4 = inlined_call_operand.vmem [shape: f32[1,72], index: 4, kind: input, shape index: {}]   ;;  %s1959_s5 = inlined_call_operand.vmem [shape: f32[1,36], index: 5, kind: input, shape index: {}]   ;;  %s1960_s6 = inlined_call_operand.vmem [shape: f32[1,36], index: 6, kind: input, shape index: {}]   ;;  %s1961_s7 = inlined_call_operand.vmem [shape: f32[1,36], index: 7, kind: input, shape index: {}]   ;;  %s1962_s8 = inlined_call_operand.vmem [shape: f32[1,36], index: 8, kind: input, shape index: {}]   ;;  %s1963_s9 = inlined_call_operand.vmem [shape: f32[1,36], index: 9, kind: input, shape index: {}]   ;;  %s1964_s10 = inlined_call_operand.vmem [shape: f32[1,36], index: 10, kind: input, shape index: {}]   ;;  %s1965_s11 = inlined_call_operand.vmem [shape: f32[1,36], index: 11, kind: input, shape index: {}]   ;;  %s1966_s12 = inlined_call_operand.vmem [shape: f32[1,36], index: 12, kind: input, shape index: {}]   ;;  %s1967_s13 = inlined_call_operand.hbm [shape: f32[2,72], index: 13, kind: output, shape index: {0}]   ;;  %s1968_s14 = inlined_call_operand.hbm [shape: f32[1,36], index: 14, kind: output, shape index: {1}]   ;;  %s1969_s15 = inlined_call_operand.hbm [shape: f32[1,36], index: 15, kind: output, shape index: {2}]   ;;  %s1970_s16 = inlined_call_operand.hbm [shape: f32[1,36], index: 16, kind: output, shape index: {3}]   ;;  %s1971_s17 = inlined_call_operand.hbm [shape: f32[1,36], index: 17, kind: output, shape index: {4}]   ;;  %s1972_s1 = inlined_call_operand.hbm [shape: s32[5], index: 1, kind: input, shape index: {}]   ;;  %s1973_s2 = inlined_call_operand.vmem [shape: s32[25], index: 2, kind: input, shape index: {}]  }
   0x1   :  { %2003 = sst [smem:[#allocation47_spill]] %s1956_s0  ;;  %s29_s29 = sshll.u32 %s1972_s1, 4  ;;  %s30_s29 = int_to_ptr.hbm [resolvable:$true] %s29_s29 }
   0x2   :  { %2004 = sst [smem:[#allocation48_spill]] %s1957_s3  ;;  %s1368_s0 = smov [#allocation3]  }
   0x3   :  { %2005 = sst [smem:[#allocation49_spill]] %s1958_s4  ;;  %s34_s3 = sshll.u32 %s1973_s2, 4  ;;  %s35_s3 = int_to_ptr.vmem [resolvable:$true] %s34_s3 }
   0x4   :  { %2006 = sst [smem:[#allocation50_spill]] %s1959_s5 }
   0x5   :  { %2007 = sst [smem:[#allocation51_spill]] %s1960_s6 }
   0x6   :  { %2008 = sst [smem:[#allocation52_spill]] %s1961_s7 }
   0x7   :  { %2009 = sst [smem:[#allocation53_spill]] %s1962_s8 }
   0x8   :  { %2010 = sst [smem:[#allocation54_spill]] %s1963_s9 }
   0x9   :  { %2011 = sst [smem:[#allocation55_spill]] %s1964_s10 }
   0xa   :  { %2012 = sst [smem:[#allocation56_spill]] %s1965_s11 }
   0xb   :  { %2013 = sst [smem:[#allocation57_spill]] %s1966_s12 }
   0xc   :  { %2014 = sst [smem:[#allocation58_spill]] %s1967_s13 }
   0xd   :  { %2015 = sst [smem:[#allocation59_spill]] %s1968_s14 }
   0xe   :  { %2016 = sst [smem:[#allocation60_spill]] %s1969_s15 }
   0xf   :  { %2017 = sst [smem:[#allocation61_spill]] %s1970_s16 }
  0x10   :  { %2018 = sst [smem:[#allocation62_spill]] %s1971_s17 }
  0x11   :  { %s2019_s26 = sld [smem:[#allocation47_spill]] }
  0x17   :  { %s24_s13 = sshll.u32 %s2019_s26, 4  ;;  %s25_s13 = int_to_ptr.hbm [resolvable:$true] %s24_s13 }
  0x18   :  { %27 = dma.hbm_to_smem %s25_s13, 16, %s1368_s0, [#allocation2] }
  0x19   :  { %32 = dma.hbm_to_smem %s30_s29, 16, %s1369_s30, [#allocation2] }
  0x1a   :  { %37 = dma.vmem_to_smem %s35_s3, 16, %s1370_s20, [#allocation2] }
  0x1b   :  { %1282 = dma.done.wait [#allocation2], 48 }
  0x1c   :  { %1283 = vsyncadd [#allocation2], 4294967248 }
  0x1d   :  { %40 = sfence }
  0x1e   :  { %41 = vsyncpa [#allocation7], 0 }
  0x1f   :  { %43 = vsyncpa [#allocation7 + $0x1], 0 }
  0x20   :  { %44 = vsyncpa [#allocation9], 0 }
  0x21   :  { %46 = vsyncpa [#allocation9 + $0x1], 0 }
  0x22   :  { %47 = vsyncpa [#allocation12], 0 }
  0x23   :  { %49 = vsyncpa [#allocation12 + $0x1], 0  ;;  %s1470_s1 = smov 0   ;;  %s1472_s13 = smov 0  }
  0x24   :  { %s1474_s21 = smov 0   ;;  %s1476_s22 = smov 0  }
  0x25   :  { %s1478_s2 = smov 0   ;;  %s1480_s23 = smov 0  }
  0x26   :  { %s1482_s24 = smov 0   ;;  %s1484_s25 = smov 0  }
  0x27   :  { %s1486_s26 = smov 0   ;;  %s1488_s27 = smov 0  }
  0x28   :  { %s1490_s28 = smov 0   ;;  %s1492_s29 = smov 0  }
  0x29   :  { %s1494_s0 = smov 0   ;;  %s1496_s30 = smov 0  }
  0x2a   :  { %s1498_s18 = smov 0   ;;  %s1500_s19 = smov 0  }
  0x2b LB: > { %2020 = sst [smem:[#allocation25_spill]] %s1310_s13  ;;  %s1551_s3 = sadd.s32 4294967295, %s1366_s19   ;;  %s1366_s19 = sphi %s1500_s19, %s2085_s19   ;;  %s1362_s18 = sphi %s1498_s18, %s2099_s18   ;;  %s1358_s30 = sphi %s1496_s30, %s2102_s30   ;;  %s1354_s0 = sphi %s1494_s0, %s2101_s0   ;;  %s1350_s29 = sphi %s1492_s29, %s2097_s29   ;;  %s1346_s28 = sphi %s1490_s28, %s2096_s28   ;;  %s1342_s27 = sphi %s1488_s27, %s2095_s27   ;;  %s1338_s26 = sphi %s1486_s26, %s2094_s26   ;;  %s1334_s25 = sphi %s1484_s25, %s2093_s25   ;;  %s1330_s24 = sphi %s1482_s24, %s2092_s24   ;;  %s1326_s23 = sphi %s1480_s23, %s2091_s23   ;;  %s1322_s2 = sphi %s1478_s2, %s2090_s2   ;;  %s1318_s22 = sphi %s1476_s22, %s2089_s22   ;;  %s1314_s21 = sphi %s1474_s21, %s2088_s21   ;;  %s1310_s13 = sphi %s1472_s13, %s2087_s13   ;;  %s1306_s1 = sphi %s1470_s1, %s2086_s1  }
  0x2c   : > { %2021 = sst [smem:[#allocation26_spill]] %s1314_s21  ;;  %s1555_s17 = sadd.s32 1, %s1366_s19  }
  0x2d   : > { %2022 = sst [smem:[#allocation27_spill]] %s1322_s2  ;;  %s1558_s15 = smul.u32 5, %s1366_s19 }
  0x2e   : > { %2023 = sst [smem:[#allocation28_spill]] %s1326_s23  ;;  %s1561_s16 = smul.u32 5, %s1555_s17 }
  0x2f   : > { %2024 = sst [smem:[#allocation29_spill]] %s1334_s25  ;;  %s276_s14 = sadd.s32 1, %s1362_s18 }
  0x30   : > { %2025 = sst [smem:[#allocation30_spill]] %s1338_s26  ;;  %p286_p0 = scmp.ne.s32.totalorder %s1362_s18, %s1358_s30 }
  0x31   : > { %2026 = sst [smem:[#allocation31_spill]] %s1346_s28  ;;  %p287_p1 = scmp.eq.s32.totalorder %s1551_s3, 4 }
  0x32   : > { %2027 = sst [smem:[#allocation32_spill]] %s1350_s29  ;;  %p292_p2 = scmp.ne.s32.totalorder %s1358_s30, %s1354_s0 }
  0x33   : > { %2028 = sst [smem:[#allocation33_spill]] %s1354_s0  ;;  %s2031_s11 = sadd.s32 4294967294, %s1366_s19  }
  0x34   : > { %2029 = sst [smem:[#allocation34_spill]] %s1362_s18  ;;  %p1573_p3 = scmp.eq.s32.totalorder %s2031_s11, 4 }
  0x35   : > { %2030 = sst [smem:[#allocation35_spill]] %s1555_s17  ;;  %p1579_p4 = por %p287_p1, %p286_p0 }
  0x36   : > { %s270_s12 = sld [smem:[#allocation5 + %s1558_s15]]  ;;  %s300_s9 = sadd.s32 1, %s1558_s15 }
  0x37   : > { %s272_s20 = sld [smem:[#allocation5 + %s1561_s16]]  ;;  %p1586_p5 = por %p1573_p3, %p292_p2 }
  0x38   : > { %s2033_s17 = scalar_select %p1579_p4, 1, 0 }
  0x39   : > { %s2035_s8 = scalar_select %p1586_p5, 1, 0 }
  0x3a   : > { %2034 = sst [smem:[#allocation36_spill]] %s2033_s17  ;;  %s303_s7 = sadd.s32 1, %s1561_s16 }
  0x3b   : > { %2036 = sst [smem:[#allocation37_spill]] %s2035_s8  ;;  %s308_s11 = sadd.s32 1, %s1350_s29 }
  0x3c   : > { %s301_s0 = sld [smem:[#allocation5 + %s300_s9]]  ;;  %p318_p6 = scmp.ne.s32.totalorder %s1350_s29, %s1346_s28 }
  0x3d   : > { %s304_s6 = sld [smem:[#allocation5 + %s303_s7]]  ;;  %s273_s5 = ssub.s32 %s270_s12, %s272_s20 }
  0x3e   : > { %p324_p7 = scmp.ne.s32.totalorder %s1346_s28, %s1342_s27  ;;  %p274_p8 = scmp.eq.s32.totalorder %s273_s5, 0 }
  0x3f   : > { %p1598_p9 = por %p318_p6, %p287_p1  ;;  %s332_s7 = sadd.s32 2, %s1558_s15 }
  0x40   : > { %p1604_p10 = por %p324_p7, %p1573_p3  ;;  %s333_s12 = sld [smem:[#allocation5 + %s332_s7]] }
  0x41   : > { %s2037_s8 = scalar_select %p1598_p9, 1, 0 }
  0x42   : > { %s2039_s9 = scalar_select %p1604_p10, 1, 0 }
  0x43   : > { %2038 = sst [smem:[#allocation38_spill]] %s2037_s8  ;;  %s335_s20 = sadd.s32 2, %s1561_s16 }
  0x44   : > { %2040 = sst [smem:[#allocation39_spill]] %s2039_s9  ;;  %s305_s27 = ssub.s32 %s301_s0, %s304_s6 }
  0x45   : > { %s1610_s17 = scalar_select %p274_p8, %s1362_s18, %s276_s14  }
  0x46   : > { %s336_s5 = sld [smem:[#allocation5 + %s335_s20]]  ;;  %p306_p11 = scmp.eq.s32.totalorder %s305_s27, 0 }
  0x47   : > { %2041 = sst [smem:[#allocation40_spill]] %s1610_s17  ;;  %s340_s8 = sadd.s32 1, %s1338_s26 }
  0x48   : > { %p350_p12 = scmp.ne.s32.totalorder %s1338_s26, %s1334_s25  ;;  %p356_p13 = scmp.ne.s32.totalorder %s1334_s25, %s1330_s24 }
  0x49   : > { %s1619_s9 = scalar_select %p306_p11, %s1350_s29, %s308_s11  }
  0x4a   : > { %p1623_p0 = por %p350_p12, %p287_p1  ;;  %p1629_p2 = por %p356_p13, %p1573_p3 }
  0x4b   : > { %2042 = sst [smem:[#allocation41_spill]] %s1619_s9  ;;  %s364_s0 = sadd.s32 3, %s1558_s15 }
  0x4c   : > { %s2043_s14 = scalar_select %p1623_p0, 1, 0 }
  0x4d   : > { %s2044_s6 = scalar_select %p1629_p2, 1, 0 }
  0x4e   : > { %s367_s7 = sadd.s32 3, %s1561_s16  ;;  %s337_s20 = ssub.s32 %s333_s12, %s336_s5 }
  0x4f   : > { %s365_s24 = sld [smem:[#allocation5 + %s364_s0]]  ;;  %p338_p6 = scmp.eq.s32.totalorder %s337_s20, 0 }
  0x50   : > { %s368_s11 = sld [smem:[#allocation5 + %s367_s7]]  ;;  %s372_s27 = sadd.s32 1, %s1326_s23 }
  0x51   : > { %p382_p7 = scmp.ne.s32.totalorder %s1326_s23, %s1322_s2  ;;  %p388_p11 = scmp.ne.s32.totalorder %s1322_s2, %s1318_s22 }
  0x52   : > { %s1639_s17 = scalar_select %p338_p6, %s1338_s26, %s340_s8  }
  0x53   : > { %p1643_p8 = por %p382_p7, %p287_p1  ;;  %s396_s12 = sadd.s32 4, %s1558_s15 }
  0x54   : > { %2045 = sst [smem:[#allocation42_spill]] %s1639_s17  ;;  %s399_s5 = sadd.s32 4, %s1561_s16 }
  0x55   : > { %p1653_p12 = por %p388_p11, %p1573_p3  ;;  %s397_s7 = sld [smem:[#allocation5 + %s396_s12]] }
  0x56   : > { %s369_s20 = ssub.s32 %s365_s24, %s368_s11  ;;  %s400_s8 = sld [smem:[#allocation5 + %s399_s5]] }
  0x57   : > { %s2047_s0 = scalar_select %p1653_p12, 1, 0 }
  0x58   : > { %p370_p13 = scmp.eq.s32.totalorder %s369_s20, 0  ;;  %p414_p6 = scmp.ne.s32.totalorder %s1314_s21, %s1310_s13 }
  0x59   : > { %2048 = sst [smem:[#allocation43_spill]] %s2047_s0  ;;  %p420_p2 = scmp.ne.s32.totalorder %s1310_s13, %s1306_s1 }
  0x5a   : > { %s1662_s9 = scalar_select %p370_p13, %s1326_s23, %s372_s27  }
  0x5b   : > { %p1666_p7 = por %p414_p6, %p287_p1  ;;  %p1672_p10 = por %p420_p2, %p1573_p3 }
  0x5c   : > { %2049 = sst [smem:[#allocation44_spill]] %s1662_s9  ;;  %p861_p11 = scmp.ge.s32.totalorder %s1366_s19, 1 }
  0x5d   : > { %s2051_s15 = scalar_select %p1672_p10, 1, 0 }
  0x5e   : > { %p469_p12 = scmp.lt.s32.totalorder %s1366_s19, 6  ;;  %s401_s16 = ssub.s32 %s397_s7, %s400_s8 }
  0x5f   : > { %2052 = sst [smem:[#allocation45_spill]] %s2051_s15  ;;  %s404_s24 = sadd.s32 1, %s1314_s21 }
  0x60   : > { %p402_p5 = scmp.eq.s32.totalorder %s401_s16, 0  ;;  %p470_p0 = pnand %p861_p11, %p469_p12 }
  0x61   : > { %s1993_s10 = sand.u32 (!%p470_p0), 1, %s1358_s30   ;;  %s506_s1 = sand.u32 (!%p470_p0), 1, %s1346_s28  }
  0x62   : > { %s1680_s11 = scalar_select %p402_p5, %s1314_s21, %s404_s24  }
  0x63   : > { %473 = sbr.rel (%p470_p0) target bundleno = 286 (0x11e), region = 60  ;;  %s1686_s27 = sshll.u32 (!%p470_p0), %s1993_s10, 1 }
  0x64   : > { %2053 = sst [smem:[#allocation46_spill]] %s1680_s11  ;;  %s512_s12 = sand.u32 (!%p470_p0), 1, %s1334_s25  }
  0x65   : > { %s518_s5 = sand.u32 (!%p470_p0), 1, %s1322_s2   ;;  %s524_s7 = sand.u32 (!%p470_p0), 1, %s1310_s13  }
  0x66   : > { %s1692_s20 = sld [smem:[#allocation3 + %s1551_s3]] (!%p470_p0)  ;;  %s1995_s24 = scalar_lea.vmem (!%p470_p0), [#allocation6], %s1686_s27 }
  0x67   : > { %s541_s8 = sld [smem:[#allocation4 + %s1551_s3]] (!%p470_p0)  ;;  %s1698_s29 = scalar_lea.vmem (!%p470_p0), [#allocation8], %s506_s1 }
  0x68   : > { %s1700_s17 = scalar_lea.vmem [#allocation10], %s512_s12  ;;  %s1702_s26 = scalar_lea.vmem [#allocation11], %s518_s5 }
  0x69   : > { %s1704_s28 = scalar_lea.vmem [#allocation13], %s524_s7 }
  0x6c   : > { %p863_p1 = scmp.ne.s32.totalorder %s1692_s20, 0 }
  0x6d   : > { %s1695_s16 = scvt.s32.f32 %s541_s8  ;;  %s2054_s4 = sld [smem:[#allocation49_spill]] (!%p863_p1) }
  0x6e   : > { %546 = sbr.rel (%p863_p1) target bundleno = 128 (0x80), region = 64  ;;  %s2055_s5 = sld [smem:[#allocation48_spill]] (!%p863_p1) }
  0x73   : > { %v547_v0 = vlaneseq  ;;  %v550_v2 = vstv %s1695_s16  ;;  %v1040_v4 = vld [vmem:[%s2054_s4] ss:$0 sm:$0xff]  ;;  %vm562_vm0 = vcmask 582656  }
  0x74   : > { %v1041_v6 = vld [vmem:[%s2055_s5] ss:$0 sm:$0xff] }
  0x75   : > { %v548_v1 = vshrl.u32 %v547_v0, 7 }
  0x77   : > { %v549_v3 = vcvt.s32.f32 %v548_v1 }
  0x79   : > { %v551_v5 = vadd.f32 %v550_v2, %v549_v3 }
  0x7b   : > { %v557_v7 = vmul.f32 %v1040_v4, %v551_v5 }
  0x7d   : > { %v561_v8 = vadd.f32 %v1041_v6, %v557_v7 }
  0x7f   : > { %563 = vst.msk [vmem:[%s1995_s24] sm:$0x3] %vm562_vm0, %v561_v8 }
  0x80 PF: > { %p864_p3 = scmp.ne.s32.totalorder %s1692_s20, 1 }
  0x81   : > { %s2056_s9 = sld [smem:[#allocation50_spill]] (!%p864_p3) }
  0x82   : > { %567 = sbr.rel (%p864_p3) target bundleno = 142 (0x8e), region = 68  ;;  %s2057_s4 = sld [smem:[#allocation51_spill]] (!%p864_p3) }
  0x87   : > { %v568_v9 = vld [vmem:[%s2056_s9] sm:$0x1]  ;;  %v570_v11 = vstv %s1695_s16  ;;  %vm573_vm1 = vcmask 286720  }
  0x88   : > { %v569_v10 = vld [vmem:[%s2057_s4] sm:$0x1] }
  0x89   : > { %v571_v12 = vmul.f32 %v570_v11, %v569_v10 }
  0x8b   : > { %v572_v13 = vadd.f32 %v571_v12, %v568_v9 }
  0x8d   : > { %574 = vst.msk [vmem:[%s1698_s29] sm:$0x1] %vm573_vm1, %v572_v13 }
  0x8e PF: > { %p865_p5 = scmp.ne.s32.totalorder %s1692_s20, 2 }
  0x8f   : > { %s2058_s5 = sld [smem:[#allocation52_spill]] (!%p865_p5) }
  0x90   : > { %578 = sbr.rel (%p865_p5) target bundleno = 156 (0x9c), region = 72  ;;  %s2059_s7 = sld [smem:[#allocation53_spill]] (!%p865_p5) }
  0x95   : > { %v579_v14 = vld [vmem:[%s2058_s5] sm:$0x1]  ;;  %v581_v16 = vstv %s1695_s16  ;;  %vm584_vm2 = vcmask 286720  }
  0x96   : > { %v580_v15 = vld [vmem:[%s2059_s7] sm:$0x1] }
  0x97   : > { %v582_v17 = vmul.f32 %v581_v16, %v580_v15 }
  0x99   : > { %v583_v18 = vadd.f32 %v582_v17, %v579_v14 }
  0x9b   : > { %585 = vst.msk [vmem:[%s1700_s17] sm:$0x1] %vm584_vm2, %v583_v18 }
  0x9c PF: > { %p866_p0 = scmp.ne.s32.totalorder %s1692_s20, 3 }
  0x9d   : > { %s2060_s8 = sld [smem:[#allocation54_spill]] (!%p866_p0) }
  0x9e   : > { %589 = sbr.rel (%p866_p0) target bundleno = 170 (0xaa), region = 76  ;;  %s2061_s5 = sld [smem:[#allocation55_spill]] (!%p866_p0) }
  0xa3   : > { %v590_v19 = vld [vmem:[%s2060_s8] sm:$0x1]  ;;  %v592_v21 = vstv %s1695_s16  ;;  %vm595_vm3 = vcmask 286720  }
  0xa4   : > { %v591_v20 = vld [vmem:[%s2061_s5] sm:$0x1] }
  0xa5   : > { %v593_v22 = vmul.f32 %v592_v21, %v591_v20 }
  0xa7   : > { %v594_v23 = vadd.f32 %v593_v22, %v590_v19 }
  0xa9   : > { %596 = vst.msk [vmem:[%s1702_s26] sm:$0x1] %vm595_vm3, %v594_v23 }
  0xaa PF: > { %p867_p2 = scmp.ne.s32.totalorder %s1692_s20, 4 }
  0xab   : > { %s2062_s7 = sld [smem:[#allocation56_spill]] (!%p867_p2) }
  0xac   : > { %600 = sbr.rel (%p867_p2) target bundleno = 184 (0xb8), region = 80  ;;  %s2063_s8 = sld [smem:[#allocation57_spill]] (!%p867_p2) }
  0xb1   : > { %v601_v24 = vld [vmem:[%s2062_s7] sm:$0x1]  ;;  %v603_v26 = vstv %s1695_s16  ;;  %vm606_vm4 = vcmask 286720  }
  0xb2   : > { %v602_v25 = vld [vmem:[%s2063_s8] sm:$0x1] }
  0xb3   : > { %v604_v27 = vmul.f32 %v603_v26, %v602_v25 }
  0xb5   : > { %v605_v28 = vadd.f32 %v604_v27, %v601_v24 }
  0xb7   : > { %607 = vst.msk [vmem:[%s1704_s28] sm:$0x1] %vm606_vm4, %v605_v28 }
  0xb8 PF: > { %s1753_s12 = smul.u32 5, %s1551_s3  ;;  %s613_s9 = sand.u32 1, %s1551_s3  }
  0xb9   : > { %s875_s16 = scalar_select %p1598_p9, [#allocation5], [#allocation15] }
  0xba   : > { %s649_s5 = sadd.s32 1, %s1753_s12  ;;  %s681_s25 = sadd.s32 3, %s1753_s12 }
  0xbb   : > { %s2104_s5 = smov (!%p1598_p9, %s649_s5), 0  ;;  %s2106_s25 = smov (!%p1643_p8, %s681_s25), 0 }
  0xbc   : > { %s650_s7 = sld [smem:[%s875_s16 + %s2104_s5]]  ;;  %s655_s10 = sshll.u32 %s1698_s29, 4  ;;  %s656_s10 = int_to_ptr.vmem [resolvable:$true] %s655_s10 }
  0xbd   : > { %s881_s4 = scalar_select %p1643_p8, [#allocation5], [#allocation17] }
  0xbe   : > { %s872_s24 = scalar_select %p1579_p4, [#allocation5], [#allocation14] }
  0xbf   : > { %s682_s8 = sld [smem:[%s881_s4 + %s2106_s25]]  ;;  %s687_s15 = sshll.u32 %s1702_s26, 4  ;;  %s688_s15 = int_to_ptr.vmem [resolvable:$true] %s687_s15 }
  0xc0   : > { %s2066_s11 = sld [smem:[#allocation59_spill]]  ;;  %s1775_s0 = scalar_lea.sflag [#allocation9], %s613_s9 }
  0xc6   : > { %s653_s21 = scalar_lea.hbm %s2066_s11, %s650_s7  ;;  %s1098_s4 = scalar_lea.hbm %s2066_s11, 1 }
  0xc7   : > { %s657_s13 = sshll.u32 %s653_s21, 4  ;;  %s658_s13 = int_to_ptr.hbm [resolvable:$true] %s657_s13 }
  0xc8   : > { %s1092_s5 = sshra.s32 %s658_s13, 4  ;;  %s1093_s5 = int_to_ptr.hbm [resolvable:$true] %s1092_s5 }
  0xc9   : > { %s1094_s16 = scalar_lea.hbm %s1093_s5, 1  ;;  %p1099_p11 = scmp.lt.s32.totalorder %s1093_s5, %s2066_s11 }
  0xca   : > { %p1095_p12 = scmp.ne.s32.totalorder %s1093_s5, %s1094_s16  ;;  %p1100_p1 = scmp.lt.s32.totalorder %s1098_s4, %s1094_s16 }
  0xcc   : > { %p1096_p13 = pnand %p1095_p12, %p1598_p9  ;;  %p1101_p3 = por %p1100_p1, %p1099_p11 }
  0xce   : > { %p1097_p6 = pneg %p1096_p13 }
  0xd0   : > { %p1102_p5 = pnand %p1101_p3, %p1097_p6 }
  0xd2   : > { %1105 = shalt.err (!%p1102_p5)
}
  0xd3   : > { %877 = dma.vmem_to_hbm [thread:$0]  (%p1598_p9), %s656_s10, 16, %s658_s13, %s1775_s0  }
  0xd4   : > { %s2067_s7 = sld [smem:[#allocation61_spill]]  ;;  %s2068_s2 = scalar_lea.vmem [#allocation6], %s1686_s27 }
  0xd5   : > { %s1793_s5 = sshll.u32 %s2068_s2, 4  ;;  %s665_s16 = sadd.s32 2, %s1753_s12  ;;  %s640_s5 = int_to_ptr.vmem [resolvable:$true] %s1793_s5 }
  0xd6   : > { %s1798_s4 = scalar_lea.sflag [#allocation12], %s613_s9 }
  0xda   : > { %s685_s29 = scalar_lea.hbm %s2067_s7, %s682_s8  ;;  %s1126_s8 = scalar_lea.hbm %s2067_s7, 1 }
  0xdb   : > { %s689_s25 = sshll.u32 %s685_s29, 4  ;;  %s690_s25 = int_to_ptr.hbm [resolvable:$true] %s689_s25 }
  0xdc   : > { %s1120_s1 = sshra.s32 %s690_s25, 4  ;;  %s1121_s1 = int_to_ptr.hbm [resolvable:$true] %s1120_s1 }
  0xdd   : > { %s1122_s23 = scalar_lea.hbm %s1121_s1, 1  ;;  %p1127_p12 = scmp.lt.s32.totalorder %s1121_s1, %s2067_s7 }
  0xde   : > { %p1123_p0 = scmp.ne.s32.totalorder %s1121_s1, %s1122_s23  ;;  %p1128_p13 = scmp.lt.s32.totalorder %s1126_s8, %s1122_s23 }
  0xe0   : > { %p1124_p9 = pnand %p1123_p0, %p1643_p8  ;;  %p1129_p6 = por %p1128_p13, %p1127_p12 }
  0xe2   : > { %p1125_p2 = pneg %p1124_p9 }
  0xe4   : > { %p1130_p11 = pnand %p1129_p6, %p1125_p2 }
  0xe6   : > { %1133 = shalt.err (!%p1130_p11)
}
  0xe7   : > { %883 = dma.vmem_to_hbm [thread:$0]  (%p1643_p8), %s688_s15, 16, %s690_s25, %s1798_s4  }
  0xe8   : > { %s873_s3 = scalar_select %p1579_p4, %s1753_s12, 0 }
  0xe9   : > { %p2069_p1 = scmp.ne.s32.totalorder %s2043_s14, 0  ;;  %s697_s26 = sadd.s32 4, %s1753_s12 }
  0xea   : > { %s633_s18 = sld [smem:[%s872_s24 + %s873_s3]]  ;;  %s671_s1 = sshll.u32 %s1700_s17, 4  ;;  %s1833_s1 = int_to_ptr.vmem [resolvable:$true] %s671_s1 }
  0xeb   : > { %s878_s9 = scalar_select %p2069_p1, [#allocation5], [#allocation16] }
  0xec   : > { %s2108_s16 = smov (!%p2069_p1, %s665_s16), 0  ;;  %s2110_s26 = smov (!%p1666_p7, %s697_s26), 0 }
  0xed   : > { %s884_s29 = scalar_select %p1666_p7, [#allocation5], [#allocation18] }
  0xee   : > { %s666_s2 = sld [smem:[%s878_s9 + %s2108_s16]]  ;;  %s703_s12 = sshll.u32 %s1704_s28, 4  ;;  %s1851_s12 = int_to_ptr.vmem [resolvable:$true] %s703_s12 }
  0xef   : > { %s1828_s25 = sld [smem:[%s884_s29 + %s2110_s26]]  ;;  %s2072_s3 = sand.u32 1, %s1358_s30  }
  0xf0   : > { %s869_s15 = sshll.u32 %s633_s18, 1  ;;  %s2070_s10 = sld [smem:[#allocation58_spill]] }
  0xf1   : > { %s2071_s16 = sld [smem:[#allocation60_spill]]  ;;  %s609_s9 = scalar_lea.sflag [#allocation7], %s2072_s3 }
  0xf6   : > { %s637_s8 = scalar_lea.hbm %s2070_s10, %s869_s15  ;;  %s1154_s15 = scalar_lea.hbm %s2070_s10, 2 }
  0xf7   : > { %s641_s24 = sshll.u32 %s637_s8, 4  ;;  %s669_s17 = scalar_lea.hbm %s2071_s16, %s666_s2  ;;  %s642_s24 = int_to_ptr.hbm [resolvable:$true] %s641_s24 }
  0xf8   : > { %s1148_s7 = sshra.s32 %s642_s24, 4  ;;  %s1149_s7 = int_to_ptr.hbm [resolvable:$true] %s1148_s7 }
  0xf9   : > { %s1150_s18 = scalar_lea.hbm %s1149_s7, 2  ;;  %p1155_p0 = scmp.lt.s32.totalorder %s1149_s7, %s2070_s10 }
  0xfa   : > { %p1151_p8 = scmp.ne.s32.totalorder %s1149_s7, %s1150_s18  ;;  %p1156_p9 = scmp.lt.s32.totalorder %s1154_s15, %s1150_s18 }
  0xfc   : > { %p1152_p3 = pnand %p1151_p8, %p1579_p4  ;;  %p1157_p2 = por %p1156_p9, %p1155_p0 }
  0xfe   : > { %p1153_p5 = pneg %p1152_p3 }
 0x100   : > { %p1158_p12 = pnand %p1157_p2, %p1153_p5 }
 0x102   : > { %1161 = shalt.err (!%p1158_p12)
}
 0x103   : > { %874 = dma.vmem_to_hbm [thread:$0]  (%p1579_p4), %s640_s5, 32, %s642_s24, %s609_s9  }
 0x104   : > { %s673_s2 = sshll.u32 %s669_s17, 4  ;;  %s2073_s21 = sld [smem:[#allocation62_spill]]  ;;  %s674_s2 = int_to_ptr.hbm [resolvable:$true] %s673_s2 }
 0x105   : > { %s1176_s26 = sshra.s32 %s674_s2, 4  ;;  %s1182_s29 = scalar_lea.hbm %s2071_s16, 1  ;;  %s1177_s26 = int_to_ptr.hbm [resolvable:$true] %s1176_s26 }
 0x106   : > { %s1178_s7 = scalar_lea.hbm %s1177_s26, 1  ;;  %p1183_p4 = scmp.lt.s32.totalorder %s1177_s26, %s2071_s16 }
 0x107   : > { %p1179_p13 = scmp.ne.s32.totalorder %s1177_s26, %s1178_s7  ;;  %p1184_p8 = scmp.lt.s32.totalorder %s1182_s29, %s1178_s7 }
 0x109   : > { %p1180_p6 = pnand %p1179_p13, %p2069_p1  ;;  %p1185_p3 = por %p1184_p8, %p1183_p4 }
 0x10a   : > { %s2074_s3 = smov %s2073_s21  ;;  %s701_s27 = scalar_lea.hbm %s2073_s21, %s1828_s25 }
 0x10b   : > { %p1181_p11 = pneg %p1180_p6 }
 0x10d   : > { %p1186_p5 = pnand %p1185_p3, %p1181_p11 }
 0x10f   : > { %1189 = shalt.err (!%p1186_p5)
}
 0x110   : > { %880 = dma.vmem_to_hbm [thread:$0]  (%p2069_p1), %s1833_s1, 16, %s674_s2, %s1775_s0  }
 0x111   : > { %s705_s25 = sshll.u32 %s701_s27, 4  ;;  %s1210_s28 = scalar_lea.hbm %s2074_s3, 1  ;;  %s706_s25 = int_to_ptr.hbm [resolvable:$true] %s705_s25 }
 0x112   : > { %s1204_s17 = sshra.s32 %s706_s25, 4  ;;  %s1205_s17 = int_to_ptr.hbm [resolvable:$true] %s1204_s17 }
 0x113   : > { %s1206_s9 = scalar_lea.hbm %s1205_s17, 1  ;;  %p1211_p12 = scmp.lt.s32.totalorder %s1205_s17, %s2074_s3 }
 0x114   : > { %p1207_p0 = scmp.ne.s32.totalorder %s1205_s17, %s1206_s9  ;;  %p1212_p13 = scmp.lt.s32.totalorder %s1210_s28, %s1206_s9 }
 0x116   : > { %p1208_p9 = pnand %p1207_p0, %p1666_p7  ;;  %p1213_p6 = por %p1212_p13, %p1211_p12 }
 0x118   : > { %p1209_p2 = pneg %p1208_p9 }
 0x11a   : > { %p1214_p1 = pnand %p1213_p6, %p1209_p2 }
 0x11c   : > { %1217 = shalt.err (!%p1214_p1)
}
 0x11d   : > { %886 = dma.vmem_to_hbm [thread:$0]  (%p1666_p7), %s1851_s12, 16, %s706_s25, %s1798_s4  }
 0x11e PF: > { %s2075_s14 = sld [smem:[#allocation33_spill]]  ;;  %p908_p11 = scmp.ge.s32.totalorder %s1366_s19, 2 }
 0x11f   : > { %s2076_s0 = sld [smem:[#allocation37_spill]] }
 0x124   : > { %s717_s1 = sand.u32 1, %s2075_s14  }
 0x125   : > { %p2077_p4 = scmp.ne.s32.totalorder %s2076_s0, 0  ;;  %s718_s2 = scalar_lea.sflag [#allocation7], %s717_s1 }
 0x127   : > { %p893_p8 = pnand %p908_p11, %p2077_p4 }
 0x129   : > { %p894_p3 = pneg %p893_p8 }
 0x12b   : > { %1285 = dma.done.wait (%p894_p3), %s718_s2, 32  }
 0x12c   : > { %1287 = vsyncadd (%p894_p3), %s718_s2, 4294967264  ;;  %s2078_s21 = sadd.s32 4294967294, %s1366_s19   ;;  %s2079_s22 = sld [smem:[#allocation39_spill]] }
 0x12d   : > { %s727_s27 = sand.u32 1, %s2078_s21  }
 0x12e   : > { %s728_s4 = scalar_lea.sflag [#allocation9], %s727_s27 }
 0x132   : > { %p2080_p7 = scmp.ne.s32.totalorder %s2079_s22, 0 }
 0x134   : > { %p896_p5 = pnand %p908_p11, %p2080_p7 }
 0x136   : > { %p897_p0 = pneg %p896_p5 }
 0x138   : > { %1289 = dma.done.wait (%p897_p0), %s728_s4, 16  }
 0x139   : > { %1291 = vsyncadd (%p897_p0), %s728_s4, 4294967280  ;;  %p2081_p9 = scmp.ne.s32.totalorder %s2044_s6, 0 }
 0x13b   : > { %p899_p2 = pnand %p908_p11, %p2081_p9 }
 0x13d   : > { %p900_p12 = pneg %p899_p2 }
 0x13f   : > { %1293 = dma.done.wait (%p900_p12), %s728_s4, 16  }
 0x140   : > { %1295 = vsyncadd (%p900_p12), %s728_s4, 4294967280  ;;  %s2082_s12 = sld [smem:[#allocation43_spill]]  ;;  %s746_s26 = scalar_lea.sflag [#allocation12], %s727_s27 }
 0x146   : > { %p2083_p13 = scmp.ne.s32.totalorder %s2082_s12, 0 }
 0x148   : > { %p902_p6 = pnand %p908_p11, %p2083_p13 }
 0x14a   : > { %p903_p1 = pneg %p902_p6 }
 0x14c   : > { %1297 = dma.done.wait (%p903_p1), %s746_s26, 16  }
 0x14d   : > { %1299 = vsyncadd (%p903_p1), %s746_s26, 4294967280  ;;  %p905_p4 = pnand %p908_p11, %p1672_p10 }
 0x14f   : > { %p906_p8 = pneg %p905_p4 }
 0x151   : > { %1301 = dma.done.wait (%p906_p8), %s746_s26, 16  }
 0x152   : > { %1303 = vsyncadd (%p906_p8), %s746_s26, 4294967280  ;;  %s2085_s19 = sld [smem:[#allocation35_spill]]  ;;  %s2101_s0 = smov %s1358_s30 }
 0x153   : > { %s2086_s1 = sld [smem:[#allocation25_spill]] }
 0x154   : > { %s2087_s13 = sld [smem:[#allocation26_spill]] }
 0x155   : > { %s2088_s21 = sld [smem:[#allocation46_spill]] }
 0x156   : > { %s2089_s22 = sld [smem:[#allocation27_spill]] }
 0x157   : > { %s2090_s2 = sld [smem:[#allocation28_spill]] }
 0x158   : > { %s2091_s23 = sld [smem:[#allocation44_spill]]  ;;  %p52_p10 = scmp.ge.s32.totalorder %s2085_s19, 7  }
 0x159   : > { %s2092_s24 = sld [smem:[#allocation29_spill]] }
 0x15a   : > { %s2093_s25 = sld [smem:[#allocation30_spill]] }
 0x15b   : > { %s2094_s26 = sld [smem:[#allocation42_spill]] }
 0x15c   : > { %s2095_s27 = sld [smem:[#allocation31_spill]] }
 0x15d   : > { %s2096_s28 = sld [smem:[#allocation32_spill]] }
 0x15e   : > { %s2097_s29 = sld [smem:[#allocation41_spill]] }
 0x15f   : > { %s2098_s6 = sld [smem:[#allocation34_spill]] }
 0x160   : > { %s2099_s18 = sld [smem:[#allocation40_spill]] }
 0x161   :  { %54 = sbr.rel (!%p52_p10) target bundleno = 43 (0x2b), region = 176 }
 0x165   : > { %s2102_s30 = smov %s2098_s6 }
 0x166   :  { %760 = vsyncpa [#allocation7], 1 }
 0x167   :  { %762 = vsyncpa [#allocation7 + $0x1], 1 }
 0x168   :  { %763 = vsyncpa [#allocation9], 1 }
 0x169   :  { %765 = vsyncpa [#allocation9 + $0x1], 1 }
 0x16a   :  { %766 = vsyncpa [#allocation12], 1 }
 0x16b   :  { %768 = vsyncpa [#allocation12 + $0x1], 1 }

</bundles_post_ra>
